<compile_context>
chip_gen: v7x
topology: tpu7x:2x2x1
jax: 0.10.0
libtpu: 0.0.40
codegen_flags: <defaults>
</compile_context>

<pallas_src>
import jax
import jax.numpy as jnp
from jax.experimental import pallas as pl
from jax.experimental.pallas import tpu as pltpu


def _nbytes(a):
    return int(a.size) * a.dtype.itemsize


# ----------------------------------------------------------------------------
# Generic tiled (N, K) @ (K, M) + b matmul kernel.  Used for:
#   * the hoisted layer-1 input projection  (K = 256, M = 4*Hp)
#   * the decoder                           (K = 256, M = V padded to 128)
# ----------------------------------------------------------------------------
def _matmul_bias_kernel(x_ref, w_ref, b_ref, o_ref):
    o_ref[...] = (
        jnp.dot(x_ref[...].astype(w_ref.dtype), w_ref[...],
                preferred_element_type=jnp.float32)
        + b_ref[...]
    ).astype(o_ref.dtype)


def matmul_bias(x2d, w, b, *, tile_n=256, tile_m=2048, out_dtype=jnp.float32):
    """x2d: (N, K) f32, w: (K, M), b: (1, M) f32 -> (N, M) out_dtype.

    N must be a multiple of 8 and M a multiple of 128 (callers pad).
    Set out_dtype=jnp.bfloat16 to halve logits HBM writeback if desired.
    """
    N, K = x2d.shape
    M = w.shape[-1]
    tn = min(N, tile_n)
    tm = min(M, tile_m)
    grid = (pl.cdiv(N, tn), pl.cdiv(M, tm))

    cost = pl.CostEstimate(
        flops=int(2 * N * K * M),
        transcendentals=0,
        bytes_accessed=_nbytes(x2d) + _nbytes(w) + _nbytes(b)
        + int(N * M * jnp.dtype(out_dtype).itemsize))

    return pl.pallas_call(
        _matmul_bias_kernel,
        out_shape=jax.ShapeDtypeStruct((N, M), out_dtype),
        grid_spec=pltpu.PrefetchScalarGridSpec(
            num_scalar_prefetch=0,
            grid=grid,
            in_specs=[
                pl.BlockSpec((tn, K), lambda i, j: (i, 0)),
                pl.BlockSpec((K, tm), lambda i, j: (0, j)),
                pl.BlockSpec((1, tm), lambda i, j: (0, j)),
            ],
            out_specs=pl.BlockSpec((tn, tm), lambda i, j: (i, j)),
        ),
        compiler_params=pltpu.CompilerParams(
            dimension_semantics=("parallel", "parallel"),
            vmem_limit_bytes=32 * 1024 * 1024),
        cost_estimate=cost,
    )(x2d, w, b)


# ----------------------------------------------------------------------------
# Fused 2-layer LSTM recurrence.  The layer-1 input projection arrives
# precomputed (xproj = x @ Wx1 + b1), so each timestep only does the three
# hidden-state dots + gate nonlinearities.  Everything is VMEM-resident.
# ----------------------------------------------------------------------------
def _lstm_stack_kernel(xp_ref, wh1_ref, wx2_ref, wh2_ref, b2_ref,
                       h0_ref, c0_ref, y_ref, hT_ref, cT_ref):
    T = xp_ref.shape[0]
    Hp = hT_ref.shape[-1]
    wdt = wh1_ref.dtype

    def gates(g, c):
        # Gate layout along the last axis: [i | f | o | g], each Hp wide and
        # lane-aligned (Hp = 256).  One sigmoid covers the contiguous 3*Hp
        # slab, one tanh the last Hp.
        sig = jax.nn.sigmoid(g[:, :3 * Hp])
        u = jnp.tanh(g[:, 3 * Hp:])
        i = sig[:, 0 * Hp:1 * Hp]
        f = sig[:, 1 * Hp:2 * Hp]
        o = sig[:, 2 * Hp:3 * Hp]
        c_new = f * c + i * u
        h_new = o * jnp.tanh(c_new)
        return h_new, c_new

    def body(t, carry):
        h1, c1, h2, c2 = carry
        g1 = xp_ref[t] + jnp.dot(h1.astype(wdt), wh1_ref[...],
                                 preferred_element_type=jnp.float32)
        h1, c1 = gates(g1, c1)
        g2 = (jnp.dot(h1.astype(wdt), wx2_ref[...],
                      preferred_element_type=jnp.float32)
              + jnp.dot(h2.astype(wdt), wh2_ref[...],
                        preferred_element_type=jnp.float32)
              + b2_ref[...])
        h2, c2 = gates(g2, c2)
        y_ref[t] = h2
        return h1, c1, h2, c2

    init = (h0_ref[0], c0_ref[0], h0_ref[1], c0_ref[1])
    # unroll=2: layer-2 of step t and layer-1 of step t+1 are independent, so
    # the scheduler can overlap MXU pushes with the single-slot EUP chain.
    h1, c1, h2, c2 = jax.lax.fori_loop(0, T, body, init, unroll=2)
    hT_ref[0] = h1
    cT_ref[0] = c1
    hT_ref[1] = h2
    cT_ref[1] = c2


def lstm_stack(xproj, wh1, wx2, wh2, b2, h0, c0, *, batch_blocks=1):
    """xproj: (T, Bp, 4*Hp) f32 (layer-1 input projection, bias folded in).
    wh1/wx2/wh2: (Hp, 4*Hp), b2: (1, 4*Hp) f32, h0/c0: (2, Bp, Hp) f32.
    Returns y (T, Bp, Hp), hT (2, Bp, Hp), cT (2, Bp, Hp), all f32.
    """
    T, Bp, G = xproj.shape
    L, _, Hp = h0.shape
    assert Bp % batch_blocks == 0
    Bblk = Bp // batch_blocks

    cost = pl.CostEstimate(
        flops=int(T * 3 * 2 * Bp * Hp * 4 * Hp + T * 2 * 12 * Bp * Hp),
        transcendentals=int(T * 2 * 5 * Bp * Hp),
        bytes_accessed=_nbytes(xproj) + _nbytes(wh1) + _nbytes(wx2)
        + _nbytes(wh2) + _nbytes(b2) + 2 * (_nbytes(h0) + _nbytes(c0))
        + int(4 * T * Bp * Hp))

    out_shapes = (
        jax.ShapeDtypeStruct((T, Bp, Hp), jnp.float32),
        jax.ShapeDtypeStruct((L, Bp, Hp), jnp.float32),
        jax.ShapeDtypeStruct((L, Bp, Hp), jnp.float32),
    )
    # TODO(synk): for very large T*Bp, stream xproj/y over a T-chunk grid
    # (pltpu.emit_pipeline) instead of keeping them fully VMEM-resident
    # (matters on v7x's 64 MiB VMEM).
    return pl.pallas_call(
        _lstm_stack_kernel,
        out_shape=out_shapes,
        grid_spec=pltpu.PrefetchScalarGridSpec(
            num_scalar_prefetch=0,
            grid=(batch_blocks,),
            in_specs=[
                pl.BlockSpec((T, Bblk, G), lambda b: (0, b, 0)),
                pl.BlockSpec(wh1.shape, lambda b: (0, 0)),
                pl.BlockSpec(wx2.shape, lambda b: (0, 0)),
                pl.BlockSpec(wh2.shape, lambda b: (0, 0)),
                pl.BlockSpec(b2.shape, lambda b: (0, 0)),
                pl.BlockSpec((L, Bblk, Hp), lambda b: (0, b, 0)),
                pl.BlockSpec((L, Bblk, Hp), lambda b: (0, b, 0)),
            ],
            out_specs=[
                pl.BlockSpec((T, Bblk, Hp), lambda b: (0, b, 0)),
                pl.BlockSpec((L, Bblk, Hp), lambda b: (0, b, 0)),
                pl.BlockSpec((L, Bblk, Hp), lambda b: (0, b, 0)),
            ],
        ),
        compiler_params=pltpu.CompilerParams(
            dimension_semantics=("parallel",),
            vmem_limit_bytes=48 * 1024 * 1024),
        cost_estimate=cost,
    )(xproj, wh1, wx2, wh2, b2, h0, c0)


# ----------------------------------------------------------------------------
# Model
# ----------------------------------------------------------------------------
class SmallZarembaModelPallas:
    HIDDEN = 200
    INPUT = 200
    NUM_LAYERS = 2
    H_PAD = 256   # lane-aligned hidden width used inside kernels
    I_PAD = 256   # lane-aligned input width used inside kernels

    def __init__(self, vocab_size, key, compute_dtype=jnp.bfloat16):
        # compute_dtype=bf16 halves weight VMEM traffic and doubles MXU rate
        # on v6e/v7x (v5e's MXU also takes bf16); accumulation, gates and the
        # c-state stay f32.  Pass jnp.float32 for exact-parity testing.
        H, I, L = self.HIDDEN, self.INPUT, self.NUM_LAYERS
        Hp, Ip = self.H_PAD, self.I_PAD
        initrange = 0.1
        self.vocab_size = vocab_size
        self.V_PAD = max(128, ((vocab_size + 127) // 128) * 128)

        keys = jax.random.split(key, 3 + 3 * L)

        def unif(k, shape):
            return jax.random.uniform(k, shape, jnp.float32,
                                      -initrange, initrange)

        self.embedding = unif(keys[0], (vocab_size, H))            # f32

        dec_w = unif(keys[1], (H, vocab_size))
        self.dec_w = jnp.pad(
            dec_w, ((0, Hp - H), (0, self.V_PAD - vocab_size))
        ).astype(compute_dtype)                                    # (Hp, Vp)
        dec_b = unif(keys[2], (1, vocab_size))
        self.dec_b = jnp.pad(dec_b, ((0, 0), (0, self.V_PAD - vocab_size)))

        # LSTM weights split into input-projection (Wx) and hidden-projection
        # (Wh) parts, gate order (i, f, o, g), each gate block zero-padded to
        # (in_pad, Hp) so padded h/c lanes stay exactly zero.
        def pack_gates(k, in_dim, in_pad):
            gk = jax.random.split(k, 4)
            blocks = [jnp.pad(unif(kk, (in_dim, H)),
                              ((0, in_pad - in_dim), (0, Hp - H)))
                      for kk in gk]
            return jnp.concatenate(blocks, axis=-1)                # (in_pad, 4Hp)

        def pack_bias(k):
            gk = jax.random.split(k, 4)
            blocks = [jnp.pad(unif(kk, (1, H)), ((0, 0), (0, Hp - H)))
                      for kk in gk]
            return jnp.concatenate(blocks, axis=-1)                # (1, 4Hp) f32

        # Layer 1
        self.wx1 = pack_gates(keys[3], I, Ip).astype(compute_dtype)
        self.wh1 = pack_gates(keys[4], H, Hp).astype(compute_dtype)
        self.b1 = pack_bias(keys[5])
        # Layer 2
        self.wx2 = pack_gates(keys[6], H, Hp).astype(compute_dtype)
        self.wh2 = pack_gates(keys[7], H, Hp).astype(compute_dtype)
        self.b2 = pack_bias(keys[8])

    def init_hidden(self, batch_size):
        L, H = self.NUM_LAYERS, self.HIDDEN
        return (jnp.zeros((L, batch_size, H), jnp.float32),
                jnp.zeros((L, batch_size, H), jnp.float32))

    def __call__(self, tokens, hidden):
        # tokens: (T, B) int32
        T, B = tokens.shape
        H, Hp, Ip = self.HIDDEN, self.H_PAD, self.I_PAD
        V, Vp = self.vocab_size, self.V_PAD
        h0_all, c0_all = hidden

        # Embedding lookup (gather) stays as plain-JAX glue.
        emb = jnp.take(self.embedding, tokens, axis=0)             # (T, B, 200)

        # Pad batch to a multiple of 8 (f32 sublanes) and features to 256
        # lanes; padded lanes are zero and remain zero through the LSTM.
        Bp = max(8, ((B + 7) // 8) * 8)
        emb = jnp.pad(emb, ((0, 0), (0, Bp - B), (0, Ip - H)))
        h0 = jnp.pad(h0_all, ((0, 0), (0, Bp - B), (0, Hp - H)))
        c0 = jnp.pad(c0_all, ((0, 0), (0, Bp - B), (0, Hp - H)))

        # Hoisted layer-1 input projection: one tiled MXU matmul over all
        # T*Bp rows (dense M dim) with b1 folded in, instead of a per-step
        # dot inside the serial recurrence.
        xproj = matmul_bias(emb.reshape(T * Bp, Ip), self.wx1, self.b1)
        xproj = xproj.reshape(T, Bp, 4 * Hp)

        # TODO(synk): on v7x with Bp >= 16, pass batch_blocks=2 to split the
        # recurrence across the two TensorCores; kept at 1 so single-TC chips
        # (v5e/v6e) do not serialize two half-batch passes.
        y, hT, cT = lstm_stack(xproj, self.wh1, self.wx2, self.wh2, self.b2,
                               h0, c0, batch_blocks=1)             # (T,Bp,Hp)

        # Decoder only on real batch rows; N padded up to a multiple of 8.
        N = T * B
        Np = ((N + 7) // 8) * 8
        x2d = y[:, :B, :].reshape(N, Hp)
        if Np != N:
            x2d = jnp.pad(x2d, ((0, Np - N), (0, 0)))
        logits = matmul_bias(x2d, self.dec_w, self.dec_b)          # (Np, Vp)
        decoded = logits[:N, :V].reshape(T, B, V)

        hidden_out = (hT[:, :B, :H], cT[:, :B, :H])
        return decoded, hidden_out


if __name__ == "__main__":
    VOCAB = 16
    T, B = 8, 2

    key = jax.random.PRNGKey(0)
    k_param, k_tok = jax.random.split(key)

    model = SmallZarembaModelPallas(VOCAB, k_param)
    tokens = jax.random.randint(k_tok, (T, B), 0, VOCAB, dtype=jnp.int32)
    hidden = model.init_hidden(B)

    decoded, (h_n, c_n) = model(tokens, hidden)
    jax.block_until_ready((decoded, h_n, c_n))

    assert decoded.shape == (T, B, VOCAB)
    assert h_n.shape == (model.NUM_LAYERS, B, model.HIDDEN)
    assert c_n.shape == (model.NUM_LAYERS, B, model.HIDDEN)
    assert bool(jnp.all(jnp.isfinite(decoded)))
    assert bool(jnp.all(jnp.isfinite(h_n))) and bool(jnp.all(jnp.isfinite(c_n)))
    print("KERNEL_OK")
</pallas_src>

<mosaic_0001>
module attributes {stable_mosaic.version = 11 : i64} {
  func.func @_matmul_bias_kernel(%arg0: i32, %arg1: i32, %arg2: memref<64x256xf32, #tpu.memory_space<vmem>>, %arg3: memref<256x1024xbf16, #tpu.memory_space<vmem>>, %arg4: memref<1x1024xf32, #tpu.memory_space<vmem>>, %arg5: memref<64x1024xf32, #tpu.memory_space<vmem>>) attributes {dimension_semantics = [#tpu.dimension_semantics<parallel>, #tpu.dimension_semantics<parallel>], iteration_bounds = array<i64: 1, 1>, scalar_prefetch = 0 : i64, scratch_operands = 0 : i64, tpu.core_type = #tpu.core_type<tc>, window_params = [{transform_indices = @transform_0, window_bounds = array<i64: 64, 256>}, {transform_indices = @transform_1, window_bounds = array<i64: 256, 1024>}, {transform_indices = @transform_2, window_bounds = array<i64: 1, 1024>}, {transform_indices = @transform_3, window_bounds = array<i64: 64, 1024>}]} {
    %c0 = arith.constant 0 : index
    %c0_0 = arith.constant 0 : index
    %0 = vector.load %arg2[%c0, %c0_0] : memref<64x256xf32, #tpu.memory_space<vmem>>, vector<64x256xf32>
    %1 = arith.truncf %0 : vector<64x256xf32> to vector<64x256xbf16>
    %c0_1 = arith.constant 0 : index
    %c0_2 = arith.constant 0 : index
    %2 = vector.load %arg3[%c0_1, %c0_2] : memref<256x1024xbf16, #tpu.memory_space<vmem>>, vector<256x1024xbf16>
    %cst = arith.constant dense<0.000000e+00> : vector<64x1024xf32>
    %3 = tpu.matmul %1, %2, %cst {dimension_numbers = #tpu.dot_dimension_numbers<[1], [0], [0], [1], [0, 0, 1, 1], [], []>} : vector<64x256xbf16>, vector<256x1024xbf16>, vector<64x1024xf32> -> vector<64x1024xf32>
    %c0_3 = arith.constant 0 : index
    %c0_4 = arith.constant 0 : index
    %4 = vector.load %arg4[%c0_3, %c0_4] : memref<1x1024xf32, #tpu.memory_space<vmem>>, vector<1x1024xf32>
    %5 = vector.broadcast %4 : vector<1x1024xf32> to vector<64x1024xf32>
    %6 = arith.addf %3, %5 : vector<64x1024xf32>
    %c0_5 = arith.constant 0 : index
    %c0_6 = arith.constant 0 : index
    %7 = vector.load %arg5[%c0_5, %c0_6] : memref<64x1024xf32, #tpu.memory_space<vmem>>, vector<64x1024xf32>
    tpu.vector_store %arg5[%c0_5, %c0_6], %6 {strides = array<i32>} : memref<64x1024xf32, #tpu.memory_space<vmem>>, vector<64x1024xf32>,
    return
  }
  func.func @transform_0(%arg0: i32, %arg1: i32) -> (i32, i32) {
    %c0_i32 = arith.constant 0 : i32
    %c0_i32_0 = arith.constant 0 : i32
    return %arg0, %c0_i32 : i32, i32
  }
  func.func @transform_1(%arg0: i32, %arg1: i32) -> (i32, i32) {
    %c0_i32 = arith.constant 0 : i32
    %c0_i32_0 = arith.constant 0 : i32
    return %c0_i32, %arg1 : i32, i32
  }
  func.func @transform_2(%arg0: i32, %arg1: i32) -> (i32, i32) {
    %c0_i32 = arith.constant 0 : i32
    %c0_i32_0 = arith.constant 0 : i32
    return %c0_i32, %arg1 : i32, i32
  }
  func.func @transform_3(%arg0: i32, %arg1: i32) -> (i32, i32) {
    %c0_i32 = arith.constant 0 : i32
    return %arg0, %arg1 : i32, i32
  }
}

</mosaic_0001>

<bundles_post_ra>
// kernel: tpu_custom_call.1
= control target key start
LH: loop header
LB: loop body
LE: loop exit
PB: predicated region body
PF: predicated region fallthrough
CT: control target
= control target key end

     0   :  { %8 = vsyncpa [#allocation3], 0  ;;  %s1720_s0 = inlined_call_operand.hbm [shape: f32[64,256], index: 0, kind: input, shape index: {}]   ;;  %s1721_s1 = inlined_call_operand.hbm [shape: bf16[256,1024], index: 1, kind: input, shape index: {}]   ;;  %s1722_s2 = inlined_call_operand.hbm [shape: f32[1,1024], index: 2, kind: input, shape index: {}]   ;;  %s1723_s3 = inlined_call_operand.hbm [shape: f32[64,1024], index: 3, kind: output, shape index: {}]  }
   0x1   :  { %9 = vsyncpa [#allocation6], 0 }
   0x2   :  { %10 = vsyncpa [#allocation4], 0  ;;  %s1494_s12 = smov [#allocation5]   ;;  %s1400_s16 = scalar_lea.hbm %s1721_s1, 16384 }
   0x3   :  { %s28_s13 = sshll.u32 %s1494_s12, 4  ;;  %p1401_p0 = scmp.ne.s32.totalorder %s1721_s1, %s1400_s16  ;;  %s29_s13 = int_to_ptr.vmem [resolvable:$true] %s28_s13 }
   0x4   :  { %p1404_p1 = scmp.lt.u32.totalorder %s1400_s16, %s1721_s1 }
   0x6   :  { %p1406_p2 = pnand %p1404_p1, %p1401_p0 }
   0x8   :  { %1409 = shalt.err (!%p1406_p2)
}
   0x9   :  { %s1410_s21 = scalar_lea.vmem %s29_s13, 16384  ;;  %p1415_p4 = scmp.lt.s32.totalorder %s29_s13, %s29_s13 }
   0xa   :  { %p1411_p3 = scmp.ne.s32.totalorder %s29_s13, %s1410_s21  ;;  %p1416_p5 = scmp.lt.s32.totalorder %s1410_s21, %s1410_s21 }
   0xc   :  { %p1417_p6 = por %p1416_p5, %p1415_p4 }
   0xe   :  { %p1418_p7 = pnand %p1417_p6, %p1411_p3 }
  0x10   :  { %1421 = shalt.err (!%p1418_p7)
}
  0x11   :  { %s1495_s22 = smov 512   ;;  %s1496_s23 = smov 32  }
  0x12   :  { %34 = dma.hbm_to_vmem [thread:$0]  %s1721_s1, 16384, %s29_s13, [#allocation6], %s1495_s22, %s1495_s22, %s1496_s23  }
  0x13   :  { %s1497_s26 = smov [#allocation2]   ;;  %s1422_s30 = scalar_lea.hbm %s1720_s0, 2048 }
  0x14   :  { %s16_s27 = sshll.u32 %s1497_s26, 4  ;;  %p1423_p8 = scmp.ne.s32.totalorder %s1720_s0, %s1422_s30  ;;  %s17_s27 = int_to_ptr.vmem [resolvable:$true] %s16_s27 }
  0x15   :  { %p1426_p9 = scmp.lt.u32.totalorder %s1422_s30, %s1720_s0 }
  0x17   :  { %p1428_p10 = pnand %p1426_p9, %p1423_p8 }
  0x19   :  { %1431 = shalt.err (!%p1428_p10)
}
  0x1a   :  { %s1432_s8 = scalar_lea.vmem %s17_s27, 2048  ;;  %p1437_p12 = scmp.lt.s32.totalorder %s17_s27, %s17_s27 }
  0x1b   :  { %p1433_p11 = scmp.ne.s32.totalorder %s17_s27, %s1432_s8  ;;  %p1438_p13 = scmp.lt.s32.totalorder %s1432_s8, %s1432_s8 }
  0x1d   :  { %p1439_p0 = por %p1438_p13, %p1437_p12 }
  0x1f   :  { %p1440_p1 = pnand %p1439_p0, %p1433_p11 }
  0x21   :  { %1443 = shalt.err (!%p1440_p1)
}
  0x22   :  { %s1498_s1 = smov 256   ;;  %s1499_s9 = smov 16  }
  0x23   :  { %22 = dma.hbm_to_vmem [thread:$0]  %s1720_s0, 2048, %s17_s27, [#allocation3], %s1498_s1, %s1498_s1, %s1499_s9  }
  0x24   :  { %s1500_s12 = smov [#allocation7]   ;;  %s1444_s16 = scalar_lea.hbm %s1722_s2, 128 }
  0x25   :  { %s41_s13 = sshll.u32 %s1500_s12, 4  ;;  %p1445_p2 = scmp.ne.s32.totalorder %s1722_s2, %s1444_s16  ;;  %s42_s13 = int_to_ptr.vmem [resolvable:$true] %s41_s13 }
  0x26   :  { %p1448_p3 = scmp.lt.u32.totalorder %s1444_s16, %s1722_s2 }
  0x28   :  { %p1450_p4 = pnand %p1448_p3, %p1445_p2 }
  0x2a   :  { %1453 = shalt.err (!%p1450_p4)
}
  0x2b   :  { %s1454_s21 = scalar_lea.vmem %s42_s13, 128  ;;  %p1459_p6 = scmp.lt.s32.totalorder %s42_s13, %s42_s13 }
  0x2c   :  { %p1455_p5 = scmp.ne.s32.totalorder %s42_s13, %s1454_s21  ;;  %p1460_p7 = scmp.lt.s32.totalorder %s1454_s21, %s1454_s21 }
  0x2e   :  { %p1461_p8 = por %p1460_p7, %p1459_p6 }
  0x30   :  { %p1462_p9 = pnand %p1461_p8, %p1455_p5 }
  0x32   :  { %1465 = shalt.err (!%p1462_p9)
}
  0x33   :  { %44 = dma.hbm_to_vmem [thread:$0]  %s1722_s2, 128, %s42_s13, [#allocation6]  }
  0x34   :  { %1488 = dma.done.wait [#allocation3], 2048  }
  0x35   :  { %1489 = vsyncadd [#allocation3], 4294965248 }
  0x36   :  { %1490 = dma.done.wait [#allocation6], 16512  }
  0x37   :  { %1491 = vsyncadd [#allocation6], 4294950784  ;;  %v78_v0 = vld [vmem:[#allocation5] sm:$0xff]  ;;  %v79_v2 = vld [vmem:[#allocation5 + $0x8] sm:$0xff]  ;;  %s1501_s2 = smov [#allocation8]  }
  0x38   :  { %v82_v1 = vld [vmem:[#allocation5 + $0x20] sm:$0xff]  ;;  %v83_v4 = vld [vmem:[#allocation5 + $0x28] sm:$0xff]  ;;  %v57_v54 = vld [vmem:[#allocation2 + $0x18] sm:$0xff]  ;;  %s1249_s23 = sshll.u32 %s1501_s2, 4  ;;  %s1250_s23 = int_to_ptr.vmem [resolvable:$true] %s1249_s23 }
  0x39   :  { %v1263_v3 = vcombine.high %v78_v0, %v82_v1  ;;  %v1262_v5 = vcombine.low %v78_v0, %v82_v1  ;;  %v86_v6 = vld [vmem:[#allocation5 + $0x40] sm:$0xff]  ;;  %v1265_v8 = vcombine.high %v79_v2, %v83_v4  ;;  %v1264_v9 = vcombine.low %v79_v2, %v83_v4  ;;  %v87_v11 = vld [vmem:[#allocation5 + $0x48] sm:$0xff]  ;;  %s1466_s24 = scalar_lea.vmem %s1250_s23, 8192  ;;  %p1471_p11 = scmp.lt.s32.totalorder %s1250_s23, %s1250_s23 }
  0x3a   :  { %v90_v7 = vld [vmem:[#allocation5 + $0x60] sm:$0xff]  ;;  %v91_v12 = vld [vmem:[#allocation5 + $0x68] sm:$0xff]  ;;  %p1467_p10 = scmp.ne.s32.totalorder %s1250_s23, %s1466_s24  ;;  %p1472_p12 = scmp.lt.s32.totalorder %s1466_s24, %s1466_s24 }
  0x3b   :  { %v1271_v10 = vcombine.high %v86_v6, %v90_v7  ;;  %v94_v13 = vld [vmem:[#allocation5 + $0x80] sm:$0xff]  ;;  %888 = vmatprep.subr.bf16.mxu0 %v1263_v3  ;;  %v1273_v14 = vcombine.high %v87_v11, %v91_v12  ;;  %v95_v16 = vld [vmem:[#allocation5 + $0x88] sm:$0xff]  ;;  %961 = vmatprep.subr.bf16.mxu1 %v1265_v8  ;;  %v1270_v18 = vcombine.low %v86_v6, %v90_v7 }
  0x3c   :  { %v98_v15 = vld [vmem:[#allocation5 + $0xa0] sm:$0xff]  ;;  %v99_v17 = vld [vmem:[#allocation5 + $0xa8] sm:$0xff]  ;;  %889 = vmatpush1.bf16.msra.mxu0 %v1262_v5  ;;  %962 = vmatpush1.bf16.msra.mxu1 %v1264_v9  ;;  %v1272_v19 = vcombine.low %v87_v11, %v91_v12  ;;  %p1473_p13 = por %p1472_p12, %p1471_p11 }
  0x3d   :  { %890 = vmatprep.subr.bf16.mxu0 %v1271_v10  ;;  %v1279_v20 = vcombine.high %v94_v13, %v98_v15  ;;  %963 = vmatprep.subr.bf16.mxu1 %v1273_v14  ;;  %v1281_v21 = vcombine.high %v95_v16, %v99_v17  ;;  %v102_v22 = vld [vmem:[#allocation5 + $0xc0] sm:$0xff]  ;;  %v103_v24 = vld [vmem:[#allocation5 + $0xc8] sm:$0xff]  ;;  %v1278_v26 = vcombine.low %v94_v13, %v98_v15 }
  0x3e   :  { %v106_v23 = vld [vmem:[#allocation5 + $0xe0] sm:$0xff]  ;;  %v107_v25 = vld [vmem:[#allocation5 + $0xe8] sm:$0xff]  ;;  %v1280_v27 = vcombine.low %v95_v16, %v99_v17  ;;  %p1474_p0 = pnand %p1473_p13, %p1467_p10 }
  0x3f   :  { %v1287_v28 = vcombine.high %v102_v22, %v106_v23  ;;  %v1289_v29 = vcombine.high %v103_v24, %v107_v25  ;;  %v110_v30 = vld [vmem:[#allocation5 + $0x100] sm:$0xff]  ;;  %v111_v32 = vld [vmem:[#allocation5 + $0x108] sm:$0xff]  ;;  %v1286_v34 = vcombine.low %v102_v22, %v106_v23  ;;  %v1288_v35 = vcombine.low %v103_v24, %v107_v25 }
  0x40   :  { %891 = vmatpush1.bf16.msra.mxu0 %v1270_v18  ;;  %964 = vmatpush1.bf16.msra.mxu1 %v1272_v19  ;;  %v114_v31 = vld [vmem:[#allocation5 + $0x120] sm:$0xff]  ;;  %v115_v33 = vld [vmem:[#allocation5 + $0x128] sm:$0xff] }
  0x41   :  { %892 = vmatprep.subr.bf16.mxu0 %v1279_v20  ;;  %965 = vmatprep.subr.bf16.mxu1 %v1281_v21  ;;  %v1295_v36 = vcombine.high %v110_v30, %v114_v31  ;;  %v1297_v37 = vcombine.high %v111_v32, %v115_v33  ;;  %v118_v38 = vld [vmem:[#allocation5 + $0x140] sm:$0xff]  ;;  %v119_v40 = vld [vmem:[#allocation5 + $0x148] sm:$0xff]  ;;  %v1294_v42 = vcombine.low %v110_v30, %v114_v31 }
  0x42   :  { %v122_v39 = vld [vmem:[#allocation5 + $0x160] sm:$0xff]  ;;  %v123_v41 = vld [vmem:[#allocation5 + $0x168] sm:$0xff]  ;;  %v1296_v43 = vcombine.low %v111_v32, %v115_v33 }
  0x43   :  { %v1303_v44 = vcombine.high %v118_v38, %v122_v39  ;;  %v1305_v45 = vcombine.high %v119_v40, %v123_v41  ;;  %v126_v46 = vld [vmem:[#allocation5 + $0x180] sm:$0xff]  ;;  %v127_v48 = vld [vmem:[#allocation5 + $0x188] sm:$0xff]  ;;  %v1302_v50 = vcombine.low %v118_v38, %v122_v39  ;;  %v1304_v51 = vcombine.low %v119_v40, %v123_v41 }
  0x44   :  { %893 = vmatpush1.bf16.msra.mxu0 %v1278_v26  ;;  %966 = vmatpush1.bf16.msra.mxu1 %v1280_v27  ;;  %v130_v47 = vld [vmem:[#allocation5 + $0x1a0] sm:$0xff]  ;;  %v131_v49 = vld [vmem:[#allocation5 + $0x1a8] sm:$0xff] }
  0x45   :  { %894 = vmatprep.subr.bf16.mxu0 %v1287_v28  ;;  %967 = vmatprep.subr.bf16.mxu1 %v1289_v29  ;;  %v1311_v52 = vcombine.high %v126_v46, %v130_v47  ;;  %v55_v53 = vld [vmem:[#allocation2 + $0x8] sm:$0xff]  ;;  %v1313_v55 = vcombine.high %v127_v48, %v131_v49  ;;  %v134_v56 = vld [vmem:[#allocation5 + $0x1c0] sm:$0xff]  ;;  %v1310_v61 = vcombine.low %v126_v46, %v130_v47 }
  0x46   :  { %v138_v57 = vld [vmem:[#allocation5 + $0x1e0] sm:$0xff]  ;;  %v1560_v58 = vpack.c.bf16 %v57_v54, %v55_v53  ;;  %v135_v59 = vld [vmem:[#allocation5 + $0x1c8] sm:$0xff]  ;;  %v1312_v62 = vcombine.low %v127_v48, %v131_v49 }
  0x47   :  { %v139_v60 = vld [vmem:[#allocation5 + $0x1e8] sm:$0xff]  ;;  %v1319_v63 = vcombine.high %v134_v56, %v138_v57  ;;  %v142_v1 = vld [vmem:[#allocation5 + $0x200] sm:$0xff]  ;;  %v1318_v5 = vcombine.low %v134_v56, %v138_v57 }
  0x48   :  { %895 = vmatpush1.bf16.msra.mxu0 %v1286_v34  ;;  %968 = vmatpush1.bf16.msra.mxu1 %v1288_v35  ;;  %v1321_v0 = vcombine.high %v135_v59, %v139_v60  ;;  %v146_v2 = vld [vmem:[#allocation5 + $0x220] sm:$0xff]  ;;  %v143_v3 = vld [vmem:[#allocation5 + $0x208] sm:$0xff]  ;;  %v1320_v6 = vcombine.low %v135_v59, %v139_v60 }
  0x49   :  { %896 = vmatprep.subr.bf16.mxu0 %v1295_v36  ;;  %969 = vmatprep.subr.bf16.mxu1 %v1297_v37  ;;  %v147_v4 = vld [vmem:[#allocation5 + $0x228] sm:$0xff]  ;;  %v1327_v7 = vcombine.high %v142_v1, %v146_v2  ;;  %v150_v9 = vld [vmem:[#allocation5 + $0x240] sm:$0xff]  ;;  %v1326_v13 = vcombine.low %v142_v1, %v146_v2  ;;  %v80_v2 = vld [vmem:[#allocation5 + $0x10] sm:$0xff] }
  0x4a   :  { %920 = vmatprep.mubr.bf16.mxu0 %v1560_v58  ;;  %993 = vmatprep.mubr.bf16.mxu1 %v1560_v58  ;;  %v1329_v8 = vcombine.high %v143_v3, %v147_v4  ;;  %v154_v10 = vld [vmem:[#allocation5 + $0x260] sm:$0xff]  ;;  %v151_v11 = vld [vmem:[#allocation5 + $0x248] sm:$0xff]  ;;  %v1328_v14 = vcombine.low %v143_v3, %v147_v4  ;;  %v84_v3 = vld [vmem:[#allocation5 + $0x30] sm:$0xff] }
  0x4b   :  { %v155_v12 = vld [vmem:[#allocation5 + $0x268] sm:$0xff]  ;;  %v1335_v15 = vcombine.high %v150_v9, %v154_v10  ;;  %v158_v17 = vld [vmem:[#allocation5 + $0x280] sm:$0xff]  ;;  %v1334_v21 = vcombine.low %v150_v9, %v154_v10  ;;  %v81_v4 = vld [vmem:[#allocation5 + $0x18] sm:$0xff]  ;;  %v1267_v10 = vcombine.high %v80_v2, %v84_v3 }
  0x4c   :  { %897 = vmatpush1.bf16.msra.mxu0 %v1294_v42  ;;  %970 = vmatpush1.bf16.msra.mxu1 %v1296_v43  ;;  %v1337_v16 = vcombine.high %v151_v11, %v155_v12  ;;  %v162_v18 = vld [vmem:[#allocation5 + $0x2a0] sm:$0xff]  ;;  %v159_v19 = vld [vmem:[#allocation5 + $0x288] sm:$0xff]  ;;  %v1336_v22 = vcombine.low %v151_v11, %v155_v12  ;;  %v88_v12 = vld [vmem:[#allocation5 + $0x50] sm:$0xff] }
  0x4d   :  { %898 = vmatprep.subr.bf16.mxu0 %v1303_v44  ;;  %971 = vmatprep.subr.bf16.mxu1 %v1305_v45  ;;  %v163_v20 = vld [vmem:[#allocation5 + $0x2a8] sm:$0xff]  ;;  %v1343_v23 = vcombine.high %v158_v17, %v162_v18  ;;  %v166_v25 = vld [vmem:[#allocation5 + $0x2c0] sm:$0xff]  ;;  %v1342_v29 = vcombine.low %v158_v17, %v162_v18  ;;  %v61_v18 = vld [vmem:[#allocation2 + $0x38] sm:$0xff] }
  0x4e   :  { %v1345_v24 = vcombine.high %v159_v19, %v163_v20  ;;  %v170_v26 = vld [vmem:[#allocation5 + $0x2e0] sm:$0xff]  ;;  %v167_v27 = vld [vmem:[#allocation5 + $0x2c8] sm:$0xff]  ;;  %v1344_v30 = vcombine.low %v159_v19, %v163_v20  ;;  %v1266_v19 = vcombine.low %v80_v2, %v84_v3 }
  0x4f   :  { %v171_v28 = vld [vmem:[#allocation5 + $0x2e8] sm:$0xff]  ;;  %v1351_v31 = vcombine.high %v166_v25, %v170_v26  ;;  %v174_v33 = vld [vmem:[#allocation5 + $0x300] sm:$0xff]  ;;  %v1350_v37 = vcombine.low %v166_v25, %v170_v26  ;;  %v97_v26 = vld [vmem:[#allocation5 + $0x98] sm:$0xff] }
  0x50   :  { %899 = vmatpush1.bf16.msra.mxu0 %v1302_v50  ;;  %972 = vmatpush1.bf16.msra.mxu1 %v1304_v51  ;;  %v1353_v32 = vcombine.high %v167_v27, %v171_v28  ;;  %v178_v34 = vld [vmem:[#allocation5 + $0x320] sm:$0xff]  ;;  %v175_v35 = vld [vmem:[#allocation5 + $0x308] sm:$0xff]  ;;  %v1352_v38 = vcombine.low %v167_v27, %v171_v28  ;;  %v101_v27 = vld [vmem:[#allocation5 + $0xb8] sm:$0xff] }
  0x51   :  { %900 = vmatprep.subr.bf16.mxu0 %v1311_v52  ;;  %973 = vmatprep.subr.bf16.mxu1 %v1313_v55  ;;  %v179_v36 = vld [vmem:[#allocation5 + $0x328] sm:$0xff]  ;;  %v1359_v39 = vcombine.high %v174_v33, %v178_v34  ;;  %v182_v41 = vld [vmem:[#allocation5 + $0x340] sm:$0xff]  ;;  %v1358_v45 = vcombine.low %v174_v33, %v178_v34  ;;  %v1285_v33 = vcombine.high %v97_v26, %v101_v27  ;;  %v104_v34 = vld [vmem:[#allocation5 + $0xd0] sm:$0xff] }
  0x52   :  { %v1361_v40 = vcombine.high %v175_v35, %v179_v36  ;;  %v186_v42 = vld [vmem:[#allocation5 + $0x360] sm:$0xff]  ;;  %v183_v43 = vld [vmem:[#allocation5 + $0x348] sm:$0xff]  ;;  %v1360_v46 = vcombine.low %v175_v35, %v179_v36  ;;  %v108_v35 = vld [vmem:[#allocation5 + $0xf0] sm:$0xff] }
  0x53   :  { %v187_v44 = vld [vmem:[#allocation5 + $0x368] sm:$0xff]  ;;  %v1367_v47 = vcombine.high %v182_v41, %v186_v42  ;;  %v190_v49 = vld [vmem:[#allocation5 + $0x380] sm:$0xff]  ;;  %v1366_v53 = vcombine.low %v182_v41, %v186_v42  ;;  %v105_v36 = vld [vmem:[#allocation5 + $0xd8] sm:$0xff]  ;;  %v1284_v42 = vcombine.low %v97_v26, %v101_v27 }
  0x54   :  { %901 = vmatpush1.bf16.msra.mxu0 %v1310_v61  ;;  %974 = vmatpush1.bf16.msra.mxu1 %v1312_v62  ;;  %v1369_v48 = vcombine.high %v183_v43, %v187_v44  ;;  %v194_v50 = vld [vmem:[#allocation5 + $0x3a0] sm:$0xff]  ;;  %v191_v51 = vld [vmem:[#allocation5 + $0x388] sm:$0xff]  ;;  %v1368_v54 = vcombine.low %v183_v43, %v187_v44  ;;  %v1291_v43 = vcombine.high %v104_v34, %v108_v35  ;;  %v144_v26 = vld [vmem:[#allocation5 + $0x210] sm:$0xff] }
  0x55   :  { %902 = vmatprep.subr.bf16.mxu0 %v1319_v63  ;;  %975 = vmatprep.subr.bf16.mxu1 %v1321_v0  ;;  %v195_v52 = vld [vmem:[#allocation5 + $0x3a8] sm:$0xff]  ;;  %v1375_v55 = vcombine.high %v190_v49, %v194_v50  ;;  %v198_v57 = vld [vmem:[#allocation5 + $0x3c0] sm:$0xff]  ;;  %v1374_v62 = vcombine.low %v190_v49, %v194_v50  ;;  %v117_v49 = vld [vmem:[#allocation5 + $0x138] sm:$0xff]  ;;  %v1290_v50 = vcombine.low %v104_v34, %v108_v35 }
  0x56   :  { %v1377_v56 = vcombine.high %v191_v51, %v195_v52  ;;  %v202_v59 = vld [vmem:[#allocation5 + $0x3e0] sm:$0xff]  ;;  %v199_v60 = vld [vmem:[#allocation5 + $0x3c8] sm:$0xff]  ;;  %v1376_v63 = vcombine.low %v191_v51, %v195_v52  ;;  %v64_v52 = vld [vmem:[#allocation2 + $0x50] sm:$0xff] }
  0x57   :  { %v203_v61 = vld [vmem:[#allocation5 + $0x3e8] sm:$0xff]  ;;  %v1383_v0 = vcombine.high %v198_v57, %v202_v59  ;;  %v62_v51 = vld [vmem:[#allocation2 + $0x40] sm:$0xff]  ;;  %v148_v27 = vld [vmem:[#allocation5 + $0x230] sm:$0xff] }
  0x58   :  { %903 = vmatpush1.bf16.msra.mxu0 %v1318_v5  ;;  %976 = vmatpush1.bf16.msra.mxu1 %v1320_v6  ;;  %v1385_v1 = vcombine.high %v199_v60, %v203_v61  ;;  %v85_v5 = vld [vmem:[#allocation5 + $0x38] sm:$0xff]  ;;  %v1382_v6 = vcombine.low %v198_v57, %v202_v59  ;;  %v1384_v9 = vcombine.low %v199_v60, %v203_v61  ;;  %v59_v17 = vld [vmem:[#allocation2 + $0x28] sm:$0xff]  ;;  %v124_v57 = vld [vmem:[#allocation5 + $0x170] sm:$0xff] }
  0x59   :  { %904 = vmatprep.subr.bf16.mxu0 %v1327_v7  ;;  %977 = vmatprep.subr.bf16.mxu1 %v1329_v8  ;;  %v54_v7 = vld [vmem:[#allocation2] sm:$0xff]  ;;  %v56_v8 = vld [vmem:[#allocation2 + $0x10] sm:$0xff]  ;;  %v1269_v11 = vcombine.high %v81_v4, %v85_v5  ;;  %v1268_v20 = vcombine.low %v81_v4, %v85_v5  ;;  %v1566_v25 = vpack.c.bf16 %v61_v18, %v59_v17  ;;  %v121_v59 = vld [vmem:[#allocation5 + $0x158] sm:$0xff] }
  0x5a   :  { %v125_v60 = vld [vmem:[#allocation5 + $0x178] sm:$0xff]  ;;  %v1580_v61 = vpack.c.bf16 %v64_v52, %v62_v51  ;;  %v128_v4 = vld [vmem:[#allocation5 + $0x190] sm:$0xff] }
  0x5b   :  { %v1309_v3 = vcombine.high %v121_v59, %v125_v60  ;;  %v132_v5 = vld [vmem:[#allocation5 + $0x1b0] sm:$0xff]  ;;  %v137_v18 = vld [vmem:[#allocation5 + $0x1d8] sm:$0xff] }
  0x5c   :  { %905 = vmatpush1.bf16.msra.mxu0 %v1326_v13  ;;  %978 = vmatpush1.bf16.msra.mxu1 %v1328_v14  ;;  %v92_v13 = vld [vmem:[#allocation5 + $0x70] sm:$0xff]  ;;  %v89_v14 = vld [vmem:[#allocation5 + $0x58] sm:$0xff] }
  0x5d   :  { %906 = vmatprep.subr.bf16.mxu0 %v1335_v15  ;;  %979 = vmatprep.subr.bf16.mxu1 %v1337_v16  ;;  %v1564_v15 = vpack.c.bf16 %v56_v8, %v54_v7  ;;  %v93_v16 = vld [vmem:[#allocation5 + $0x78] sm:$0xff]  ;;  %v1274_v28 = vcombine.low %v88_v12, %v92_v13  ;;  %v140_v17 = vld [vmem:[#allocation5 + $0x1f0] sm:$0xff] }
  0x5e   :  { %v129_v7 = vld [vmem:[#allocation5 + $0x198] sm:$0xff]  ;;  %v152_v34 = vld [vmem:[#allocation5 + $0x250] sm:$0xff] }
  0x5f   :  { %v133_v8 = vld [vmem:[#allocation5 + $0x1b8] sm:$0xff]  ;;  %v156_v35 = vld [vmem:[#allocation5 + $0x270] sm:$0xff] }
  0x60   :  { %907 = vmatpush1.bf16.msra.mxu0 %v1334_v21  ;;  %980 = vmatpush1.bf16.msra.mxu1 %v1336_v22  ;;  %v1275_v21 = vcombine.high %v88_v12, %v92_v13  ;;  %v1277_v22 = vcombine.high %v89_v14, %v93_v16  ;;  %v1308_v12 = vcombine.low %v121_v59, %v125_v60  ;;  %v168_v51 = vld [vmem:[#allocation5 + $0x2d0] sm:$0xff] }
  0x61   :  { %908 = vmatprep.subr.bf16.mxu0 %v1343_v23  ;;  %981 = vmatprep.subr.bf16.mxu1 %v1345_v24  ;;  %v96_v23 = vld [vmem:[#allocation5 + $0x90] sm:$0xff]  ;;  %v1315_v13 = vcombine.high %v128_v4, %v132_v5 }
  0x62   :  { %v100_v24 = vld [vmem:[#allocation5 + $0xb0] sm:$0xff] }
  0x63   :  { %v1282_v41 = vcombine.low %v96_v23, %v100_v24  ;;  %v172_v52 = vld [vmem:[#allocation5 + $0x2f0] sm:$0xff] }
  0x64   :  { %909 = vmatpush1.bf16.msra.mxu0 %v1342_v29  ;;  %982 = vmatpush1.bf16.msra.mxu1 %v1344_v30  ;;  %v58_v29 = vld [vmem:[#allocation2 + $0x20] sm:$0xff]  ;;  %v60_v30 = vld [vmem:[#allocation2 + $0x30] sm:$0xff] }
  0x65   :  { %910 = vmatprep.subr.bf16.mxu0 %v1351_v31  ;;  %983 = vmatprep.subr.bf16.mxu1 %v1353_v32  ;;  %v1276_v31 = vcombine.low %v89_v14, %v93_v16  ;;  %v1283_v32 = vcombine.high %v96_v23, %v100_v24  ;;  %v1317_v14 = vcombine.high %v129_v7, %v133_v8  ;;  %v136_v16 = vld [vmem:[#allocation5 + $0x1d0] sm:$0xff] }
  0x66   :  { %v1323_v23 = vcombine.high %v136_v16, %v140_v17  ;;  %v176_v60 = vld [vmem:[#allocation5 + $0x310] sm:$0xff] }
  0x68   :  { %911 = vmatpush1.bf16.msra.mxu0 %v1350_v37  ;;  %984 = vmatpush1.bf16.msra.mxu1 %v1352_v38  ;;  %v109_v37 = vld [vmem:[#allocation5 + $0xf8] sm:$0xff]  ;;  %v1572_v38 = vpack.c.bf16 %v60_v30, %v58_v29  ;;  %v1322_v30 = vcombine.low %v136_v16, %v140_v17  ;;  %v196_v16 = vld [vmem:[#allocation5 + $0x3b0] sm:$0xff] }
  0x69   :  { %912 = vmatprep.subr.bf16.mxu0 %v1359_v39  ;;  %985 = vmatprep.subr.bf16.mxu1 %v1361_v40  ;;  %v63_v39 = vld [vmem:[#allocation2 + $0x48] sm:$0xff]  ;;  %v65_v40 = vld [vmem:[#allocation2 + $0x58] sm:$0xff]  ;;  %v1293_v44 = vcombine.high %v105_v36, %v109_v37 }
  0x6a   :  { %v149_v29 = vld [vmem:[#allocation5 + $0x238] sm:$0xff] }
  0x6b   :  { %v193_v17 = vld [vmem:[#allocation5 + $0x398] sm:$0xff] }
  0x6c   :  { %913 = vmatpush1.bf16.msra.mxu0 %v1358_v45  ;;  %986 = vmatpush1.bf16.msra.mxu1 %v1360_v46  ;;  %v112_v45 = vld [vmem:[#allocation5 + $0x110] sm:$0xff] }
  0x6d   :  { %914 = vmatprep.subr.bf16.mxu0 %v1367_v47  ;;  %987 = vmatprep.subr.bf16.mxu1 %v1369_v48  ;;  %v116_v46 = vld [vmem:[#allocation5 + $0x130] sm:$0xff]  ;;  %v1574_v47 = vpack.c.bf16 %v65_v40, %v63_v39  ;;  %v113_v48 = vld [vmem:[#allocation5 + $0x118] sm:$0xff]  ;;  %v1330_v39 = vcombine.low %v144_v26, %v148_v27 }
  0x70   :  { %915 = vmatpush1.bf16.msra.mxu0 %v1366_v53  ;;  %988 = vmatpush1.bf16.msra.mxu1 %v1368_v54  ;;  %v1292_v53 = vcombine.low %v105_v36, %v109_v37  ;;  %v1299_v54 = vcombine.high %v112_v45, %v116_v46  ;;  %v153_v36 = vld [vmem:[#allocation5 + $0x258] sm:$0xff] }
  0x71   :  { %916 = vmatprep.subr.bf16.mxu0 %v1375_v55  ;;  %989 = vmatprep.subr.bf16.mxu1 %v1377_v56  ;;  %v1301_v55 = vcombine.high %v113_v48, %v117_v49  ;;  %v120_v56 = vld [vmem:[#allocation5 + $0x150] sm:$0xff]  ;;  %v157_v37 = vld [vmem:[#allocation5 + $0x278] sm:$0xff] }
  0x72   :  { %v1307_v2 = vcombine.high %v120_v56, %v124_v57 }
  0x74   :  { %917 = vmatpush1.bf16.msra.mxu0 %v1374_v62  ;;  %990 = vmatpush1.bf16.msra.mxu1 %v1376_v63  ;;  %v67_v62 = vld [vmem:[#allocation2 + $0x68] sm:$0xff]  ;;  %v69_v63 = vld [vmem:[#allocation2 + $0x78] sm:$0xff] }
  0x75   :  { %918 = vmatprep.subr.bf16.mxu0 %v1383_v0  ;;  %991 = vmatprep.subr.bf16.mxu1 %v1385_v1  ;;  %v1298_v0 = vcombine.low %v112_v45, %v116_v46  ;;  %v1300_v1 = vcombine.low %v113_v48, %v117_v49  ;;  %v161_v45 = vld [vmem:[#allocation5 + $0x298] sm:$0xff]  ;;  %v1338_v48 = vcombine.low %v152_v34, %v156_v35 }
  0x76   :  { %v165_v46 = vld [vmem:[#allocation5 + $0x2b8] sm:$0xff]  ;;  %v1340_v49 = vcombine.low %v153_v36, %v157_v37 }
  0x78   :  { %919 = vmatpush1.bf16.msra.mxu0 %v1382_v6  ;;  %992 = vmatpush1.bf16.msra.mxu1 %v1384_v9  ;;  %v1582_v6 = vpack.c.bf16 %v69_v63, %v67_v62  ;;  %v1306_v9 = vcombine.low %v120_v56, %v124_v57  ;;  %v1348_v56 = vcombine.low %v161_v45, %v165_v46  ;;  %v180_v62 = vld [vmem:[#allocation5 + $0x330] sm:$0xff]  ;;  %v177_v63 = vld [vmem:[#allocation5 + $0x318] sm:$0xff] }
  0x79   :  { %1034 = vmatprep.subr.bf16.mxu0 %v1267_v10  ;;  %1107 = vmatprep.subr.bf16.mxu1 %v1269_v11  ;;  %v66_v10 = vld [vmem:[#allocation2 + $0x60] sm:$0xff]  ;;  %v68_v11 = vld [vmem:[#allocation2 + $0x70] sm:$0xff]  ;;  %v1355_v57 = vcombine.high %v168_v51, %v172_v52 }
  0x7b   :  { %921 = vmatmul.mubr.bf16.vlgmr.msra.gmra.mrb[0].mxu0 %v1564_v15  ;;  %994 = vmatmul.mubr.bf16.vlgmr.msra.gmra.mrb[0].mxu1 %v1564_v15 }
  0x7c   :  { %1035 = vmatpush1.bf16.msra.mxu0 %v1266_v19  ;;  %1108 = vmatpush1.bf16.msra.mxu1 %v1268_v20  ;;  %v141_v19 = vld [vmem:[#allocation5 + $0x1f8] sm:$0xff]  ;;  %v1588_v20 = vpack.c.bf16 %v68_v11, %v66_v10  ;;  %v1362_v10 = vcombine.low %v176_v60, %v180_v62 }
  0x7d   :  { %1036 = vmatprep.subr.bf16.mxu0 %v1275_v21  ;;  %1109 = vmatprep.subr.bf16.mxu1 %v1277_v22  ;;  %v1314_v21 = vcombine.low %v128_v4, %v132_v5  ;;  %v1316_v22 = vcombine.low %v129_v7, %v133_v8  ;;  %v1325_v24 = vcombine.high %v137_v18, %v141_v19  ;;  %v184_v5 = vld [vmem:[#allocation5 + $0x350] sm:$0xff]  ;;  %v185_v8 = vld [vmem:[#allocation5 + $0x358] sm:$0xff] }
  0x7e   :  { %930 = vmatprep.mubr.bf16.mxu0 %v1566_v25  ;;  %1003 = vmatprep.mubr.bf16.mxu1 %v1566_v25  ;;  %v188_v7 = vld [vmem:[#allocation5 + $0x370] sm:$0xff] }
  0x80   :  { %1037 = vmatpush1.bf16.msra.mxu0 %v1274_v28  ;;  %1110 = vmatpush1.bf16.msra.mxu1 %v1276_v31  ;;  %v145_v28 = vld [vmem:[#allocation5 + $0x218] sm:$0xff]  ;;  %v1324_v31 = vcombine.low %v137_v18, %v141_v19  ;;  %v1370_v19 = vcombine.low %v184_v5, %v188_v7 }
  0x81   :  { %1038 = vmatprep.subr.bf16.mxu0 %v1283_v32  ;;  %1111 = vmatprep.subr.bf16.mxu1 %v1285_v33  ;;  %v1331_v32 = vcombine.high %v144_v26, %v148_v27  ;;  %v1333_v33 = vcombine.high %v145_v28, %v149_v29  ;;  %v1332_v40 = vcombine.low %v145_v28, %v149_v29  ;;  %v197_v18 = vld [vmem:[#allocation5 + $0x3b8] sm:$0xff]  ;;  %v204_v26 = vld [vmem:[#allocation5 + $0x3f0] sm:$0xff] }
  0x82   :  { %v201_v27 = vld [vmem:[#allocation5 + $0x3d8] sm:$0xff] }
  0x83   :  { %931 = vmatmul.mubr.bf16.gmra.mrb[4].mxu0 %v1572_v38  ;;  %1004 = vmatmul.mubr.bf16.gmra.mrb[4].mxu1 %v1572_v38  ;;  %v205_v28 = vld [vmem:[#allocation5 + $0x3f8] sm:$0xff] }
  0x84   :  { %1039 = vmatpush1.bf16.msra.mxu0 %v1282_v41  ;;  %1112 = vmatpush1.bf16.msra.mxu1 %v1284_v42  ;;  %v1339_v41 = vcombine.high %v152_v34, %v156_v35  ;;  %v1341_v42 = vcombine.high %v153_v36, %v157_v37  ;;  %v1388_v34 = vcombine.low %v201_v27, %v205_v28  ;;  %v1611_v35 = vld [vmem:[#allocation7] sm:$0xff] }
  0x85   :  { %1040 = vmatprep.subr.bf16.mxu0 %v1291_v43  ;;  %1113 = vmatprep.subr.bf16.mxu1 %v1293_v44  ;;  %v160_v43 = vld [vmem:[#allocation5 + $0x290] sm:$0xff] }
  0x86   :  { %940 = vmatprep.mubr.bf16.mxu0 %v1574_v47  ;;  %1013 = vmatprep.mubr.bf16.mxu1 %v1574_v47  ;;  %v164_v44 = vld [vmem:[#allocation5 + $0x2b0] sm:$0xff] }
  0x88   :  { %1041 = vmatpush1.bf16.msra.mxu0 %v1290_v50  ;;  %1114 = vmatpush1.bf16.msra.mxu1 %v1292_v53  ;;  %v1347_v50 = vcombine.high %v160_v43, %v164_v44  ;;  %v169_v53 = vld [vmem:[#allocation5 + $0x2d8] sm:$0xff] }
  0x89   :  { %1042 = vmatprep.subr.bf16.mxu0 %v1299_v54  ;;  %1115 = vmatprep.subr.bf16.mxu1 %v1301_v55  ;;  %v173_v54 = vld [vmem:[#allocation5 + $0x2f8] sm:$0xff]  ;;  %v1346_v55 = vcombine.low %v160_v43, %v164_v44 }
  0x8a   :  { %v1357_v59 = vcombine.high %v169_v53, %v173_v54 }
  0x8b   :  { %941 = vmatmul.mubr.bf16.gmra.mrb[8].mxu0 %v1580_v61  ;;  %1014 = vmatmul.mubr.bf16.gmra.mrb[8].mxu1 %v1580_v61 }
  0x8c   :  { %1043 = vmatpush1.bf16.msra.mxu0 %v1298_v0  ;;  %1116 = vmatpush1.bf16.msra.mxu1 %v1300_v1  ;;  %v181_v0 = vld [vmem:[#allocation5 + $0x338] sm:$0xff]  ;;  %v1354_v1 = vcombine.low %v168_v51, %v172_v52 }
  0x8d   :  { %1044 = vmatprep.subr.bf16.mxu0 %v1307_v2  ;;  %1117 = vmatprep.subr.bf16.mxu1 %v1309_v3  ;;  %v1356_v2 = vcombine.low %v169_v53, %v173_v54  ;;  %v1363_v3 = vcombine.high %v176_v60, %v180_v62  ;;  %v1365_v4 = vcombine.high %v177_v63, %v181_v0 }
  0x8e   :  { %950 = vmatprep.mubr.bf16.mxu0 %v1582_v6  ;;  %1023 = vmatprep.mubr.bf16.mxu1 %v1582_v6  ;;  %v1364_v11 = vcombine.low %v177_v63, %v181_v0 }
  0x90   :  { %1045 = vmatpush1.bf16.msra.mxu0 %v1306_v9  ;;  %1118 = vmatpush1.bf16.msra.mxu1 %v1308_v12  ;;  %v189_v9 = vld [vmem:[#allocation5 + $0x378] sm:$0xff]  ;;  %v1371_v12 = vcombine.high %v184_v5, %v188_v7 }
  0x91   :  { %1046 = vmatprep.subr.bf16.mxu0 %v1315_v13  ;;  %1119 = vmatprep.subr.bf16.mxu1 %v1317_v14  ;;  %v1373_v13 = vcombine.high %v185_v8, %v189_v9  ;;  %v192_v14 = vld [vmem:[#allocation5 + $0x390] sm:$0xff] }
  0x92   :  { %v1378_v29 = vcombine.low %v192_v14, %v196_v16 }
  0x93   :  { %951 = vmatmul.mubr.bf16.gmra.mrb[12].mxu0 %v1588_v20  ;;  %1024 = vmatmul.mubr.bf16.gmra.mrb[12].mxu1 %v1588_v20 }
  0x94   :  { %1047 = vmatpush1.bf16.msra.mxu0 %v1314_v21  ;;  %1120 = vmatpush1.bf16.msra.mxu1 %v1316_v22  ;;  %v1372_v21 = vcombine.low %v185_v8, %v189_v9  ;;  %v1379_v22 = vcombine.high %v192_v14, %v196_v16 }
  0x95   :  { %1048 = vmatprep.subr.bf16.mxu0 %v1323_v23  ;;  %1121 = vmatprep.subr.bf16.mxu1 %v1325_v24  ;;  %v1381_v23 = vcombine.high %v193_v17, %v197_v18  ;;  %v200_v24 = vld [vmem:[#allocation5 + $0x3d0] sm:$0xff] }
  0x96   :  { %1066 = vmatprep.mubr.bf16.mxu0 %v1560_v58  ;;  %1139 = vmatprep.mubr.bf16.mxu1 %v1560_v58  ;;  %v1349_v58 = vcombine.high %v161_v45, %v165_v46 }
  0x98   :  { %1049 = vmatpush1.bf16.msra.mxu0 %v1322_v30  ;;  %1122 = vmatpush1.bf16.msra.mxu1 %v1324_v31  ;;  %v1380_v30 = vcombine.low %v193_v17, %v197_v18  ;;  %v1387_v31 = vcombine.high %v200_v24, %v204_v26 }
  0x99   :  { %1050 = vmatprep.subr.bf16.mxu0 %v1331_v32  ;;  %1123 = vmatprep.subr.bf16.mxu1 %v1333_v33  ;;  %v1389_v32 = vcombine.high %v201_v27, %v205_v28  ;;  %v1386_v33 = vcombine.low %v200_v24, %v204_v26 }
  0x9c   :  { %1051 = vmatpush1.bf16.msra.mxu0 %v1330_v39  ;;  %1124 = vmatpush1.bf16.msra.mxu1 %v1332_v40 }
  0x9d   :  { %1052 = vmatprep.subr.bf16.mxu0 %v1339_v41  ;;  %1125 = vmatprep.subr.bf16.mxu1 %v1341_v42 }
  0xa0   :  { %1053 = vmatpush1.bf16.msra.mxu0 %v1338_v48  ;;  %1126 = vmatpush1.bf16.msra.mxu1 %v1340_v49 }
  0xa1   :  { %1054 = vmatprep.subr.bf16.mxu0 %v1347_v50  ;;  %1127 = vmatprep.subr.bf16.mxu1 %v1349_v58 }
  0xa4   :  { %1055 = vmatpush1.bf16.msra.mxu0 %v1346_v55  ;;  %1128 = vmatpush1.bf16.msra.mxu1 %v1348_v56 }
  0xa5   :  { %1056 = vmatprep.subr.bf16.mxu0 %v1355_v57  ;;  %1129 = vmatprep.subr.bf16.mxu1 %v1357_v59 }
  0xa8   :  { %1057 = vmatpush1.bf16.msra.mxu0 %v1354_v1  ;;  %1130 = vmatpush1.bf16.msra.mxu1 %v1356_v2 }
  0xa9   :  { %1058 = vmatprep.subr.bf16.mxu0 %v1363_v3  ;;  %1131 = vmatprep.subr.bf16.mxu1 %v1365_v4 }
  0xac   :  { %1059 = vmatpush1.bf16.msra.mxu0 %v1362_v10  ;;  %1132 = vmatpush1.bf16.msra.mxu1 %v1364_v11 }
  0xad   :  { %1060 = vmatprep.subr.bf16.mxu0 %v1371_v12  ;;  %1133 = vmatprep.subr.bf16.mxu1 %v1373_v13 }
  0xb0   :  { %1061 = vmatpush1.bf16.msra.mxu0 %v1370_v19  ;;  %1134 = vmatpush1.bf16.msra.mxu1 %v1372_v21 }
  0xb1   :  { %1062 = vmatprep.subr.bf16.mxu0 %v1379_v22  ;;  %1135 = vmatprep.subr.bf16.mxu1 %v1381_v23 }
  0xb4   :  { %1063 = vmatpush1.bf16.msra.mxu0 %v1378_v29  ;;  %1136 = vmatpush1.bf16.msra.mxu1 %v1380_v30 }
  0xb5   :  { %1064 = vmatprep.subr.bf16.mxu0 %v1387_v31  ;;  %1137 = vmatprep.subr.bf16.mxu1 %v1389_v32 }
  0xb8   :  { %1065 = vmatpush1.bf16.msra.mxu0 %v1386_v33  ;;  %1138 = vmatpush1.bf16.msra.mxu1 %v1388_v34 }
  0xbb   :  { %1067 = vmatmul.mubr.bf16.vlgmr.msra.gmra.mrb[16].mxu0 %v1564_v15  ;;  %1140 = vmatmul.mubr.bf16.vlgmr.msra.gmra.mrb[16].mxu1 %v1564_v15  ;;  %v208_v15 = vlaneseq }
  0xbc   :  { %1076 = vmatprep.mubr.bf16.mxu0 %v1566_v25  ;;  %1149 = vmatprep.mubr.bf16.mxu1 %v1566_v25 }
  0xbd   :  { %v1608_v25 = vshrl.u32 %v208_v15, 7 }
  0xbf   :  { %v214_v36 = vsub.s32 1, %v1608_v25 }
  0xc3   :  { %1077 = vmatmul.mubr.bf16.gmra.mrb[20].mxu0 %v1572_v38  ;;  %1150 = vmatmul.mubr.bf16.gmra.mrb[20].mxu1 %v1572_v38  ;;  %v210_v38 = vsub.s32 0, %v1608_v25 }
  0xc4   :  { %1086 = vmatprep.mubr.bf16.mxu0 %v1574_v47  ;;  %1159 = vmatprep.mubr.bf16.mxu1 %v1574_v47  ;;  %v218_v47 = vsub.s32 2, %v1608_v25 }
  0xc5   :  { %v1617_v37 = vrot.slane %v1611_v35, %v210_v38 }
  0xcb   :  { %1087 = vmatmul.mubr.bf16.gmra.mrb[24].mxu0 %v1580_v61  ;;  %1160 = vmatmul.mubr.bf16.gmra.mrb[24].mxu1 %v1580_v61  ;;  %v222_v61 = vsub.s32 3, %v1608_v25 }
  0xcc   :  { %1096 = vmatprep.mubr.bf16.mxu0 %v1582_v6  ;;  %1169 = vmatprep.mubr.bf16.mxu1 %v1582_v6  ;;  %v1620_v6 = vrot.slane %v1611_v35, %v218_v47 }
  0xcd   :  { %v1626_v39 = vrot.slane %v1611_v35, %v222_v61 }
  0xd3   :  { %1097 = vmatmul.mubr.bf16.gmra.mrb[28].mxu0 %v1588_v20  ;;  %1170 = vmatmul.mubr.bf16.gmra.mrb[28].mxu1 %v1588_v20  ;;  %v1623_v20 = vrot.slane %v1611_v35, %v214_v36 }
 0x14e   :  { %v922_v40 = vpop.f32.mrb[0].mxu0  ;;  %v995_v42 = vpop.f32.mrb[0].mxu1 }
 0x14f   :  { %v923_v41 = vadd.f32 %v922_v40, %v1617_v37  ;;  %v924_v43 = vpop.f32.mrb[1].mxu0  ;;  %v996_v44 = vadd.f32 %v995_v42, %v1620_v6  ;;  %v997_v46 = vpop.f32.mrb[1].mxu1 }
 0x150   :  { %v925_v45 = vadd.f32 %v924_v43, %v1623_v20  ;;  %v926_v48 = vpop.f32.mrb[2].mxu0  ;;  %v998_v49 = vadd.f32 %v997_v46, %v1626_v39  ;;  %v999_v58 = vpop.f32.mrb[2].mxu1  ;;  %v226_v46 = vsub.s32 4, %v1608_v25 }
 0x151   :  { %1180 = vst [vmem:[#allocation8] sm:$0xff] %v923_v41  ;;  %v927_v50 = vadd.f32 %v926_v48, %v1617_v37  ;;  %v928_v51 = vpop.f32.mrb[3].mxu0  ;;  %1182 = vst [vmem:[#allocation8 + $0x10] sm:$0xff] %v996_v44  ;;  %v1000_v52 = vadd.f32 %v999_v58, %v1620_v6  ;;  %v1001_v54 = vpop.f32.mrb[3].mxu1  ;;  %v230_v48 = vsub.s32 5, %v1608_v25 }
 0x152   :  { %1181 = vst [vmem:[#allocation8 + $0x8] sm:$0xff] %v925_v45  ;;  %v929_v53 = vadd.f32 %v928_v51, %v1623_v20  ;;  %1183 = vst [vmem:[#allocation8 + $0x18] sm:$0xff] %v998_v49  ;;  %v1002_v55 = vadd.f32 %v1001_v54, %v1626_v39  ;;  %v238_v49 = vsub.s32 7, %v1608_v25 }
 0x153   :  { %1188 = vst [vmem:[#allocation8 + $0x40] sm:$0xff] %v927_v50  ;;  %1190 = vst [vmem:[#allocation8 + $0x50] sm:$0xff] %v1000_v52  ;;  %v1671_v50 = vrot.slane %v1611_v35, %v230_v48 }
 0x154   :  { %1189 = vst [vmem:[#allocation8 + $0x48] sm:$0xff] %v929_v53  ;;  %1191 = vst [vmem:[#allocation8 + $0x58] sm:$0xff] %v1002_v55 }
 0x156   :  { %v932_v56 = vpop.f32.mrb[4].mxu0  ;;  %v1005_v59 = vpop.f32.mrb[4].mxu1 }
 0x157   :  { %v933_v57 = vadd.f32 %v932_v56, %v1617_v37  ;;  %v934_v60 = vpop.f32.mrb[5].mxu0  ;;  %v1006_v62 = vadd.f32 %v1005_v59, %v1620_v6  ;;  %v1007_v0 = vpop.f32.mrb[5].mxu1 }
 0x158   :  { %v935_v63 = vadd.f32 %v934_v60, %v1623_v20  ;;  %v936_v1 = vpop.f32.mrb[6].mxu0  ;;  %v1008_v2 = vadd.f32 %v1007_v0, %v1626_v39  ;;  %v1009_v4 = vpop.f32.mrb[6].mxu1 }
 0x159   :  { %1196 = vst [vmem:[#allocation8 + $0x80] sm:$0xff] %v933_v57  ;;  %v937_v3 = vadd.f32 %v936_v1, %v1617_v37  ;;  %v938_v5 = vpop.f32.mrb[7].mxu0  ;;  %1198 = vst [vmem:[#allocation8 + $0x90] sm:$0xff] %v1006_v62  ;;  %v1010_v7 = vadd.f32 %v1009_v4, %v1620_v6  ;;  %v1011_v9 = vpop.f32.mrb[7].mxu1 }
 0x15a   :  { %1197 = vst [vmem:[#allocation8 + $0x88] sm:$0xff] %v935_v63  ;;  %v939_v8 = vadd.f32 %v938_v5, %v1623_v20  ;;  %1199 = vst [vmem:[#allocation8 + $0x98] sm:$0xff] %v1008_v2  ;;  %v1012_v10 = vadd.f32 %v1011_v9, %v1626_v39 }
 0x15b   :  { %1204 = vst [vmem:[#allocation8 + $0xc0] sm:$0xff] %v937_v3  ;;  %1206 = vst [vmem:[#allocation8 + $0xd0] sm:$0xff] %v1010_v7 }
 0x15c   :  { %1205 = vst [vmem:[#allocation8 + $0xc8] sm:$0xff] %v939_v8  ;;  %1207 = vst [vmem:[#allocation8 + $0xd8] sm:$0xff] %v1012_v10 }
 0x15e   :  { %v942_v11 = vpop.f32.mrb[8].mxu0  ;;  %v1015_v13 = vpop.f32.mrb[8].mxu1 }
 0x15f   :  { %v943_v12 = vadd.f32 %v942_v11, %v1617_v37  ;;  %v944_v14 = vpop.f32.mrb[9].mxu0  ;;  %v1016_v16 = vadd.f32 %v1015_v13, %v1620_v6  ;;  %v1017_v18 = vpop.f32.mrb[9].mxu1 }
 0x160   :  { %v945_v17 = vadd.f32 %v944_v14, %v1623_v20  ;;  %v946_v19 = vpop.f32.mrb[10].mxu0  ;;  %v1018_v21 = vadd.f32 %v1017_v18, %v1626_v39  ;;  %v1019_v23 = vpop.f32.mrb[10].mxu1 }
 0x161   :  { %1212 = vst [vmem:[#allocation8 + $0x100] sm:$0xff] %v943_v12  ;;  %v947_v22 = vadd.f32 %v946_v19, %v1617_v37  ;;  %v948_v24 = vpop.f32.mrb[11].mxu0  ;;  %1214 = vst [vmem:[#allocation8 + $0x110] sm:$0xff] %v1016_v16  ;;  %v1020_v26 = vadd.f32 %v1019_v23, %v1620_v6  ;;  %v1021_v28 = vpop.f32.mrb[11].mxu1 }
 0x162   :  { %1213 = vst [vmem:[#allocation8 + $0x108] sm:$0xff] %v945_v17  ;;  %v949_v27 = vadd.f32 %v948_v24, %v1623_v20  ;;  %1215 = vst [vmem:[#allocation8 + $0x118] sm:$0xff] %v1018_v21  ;;  %v1022_v29 = vadd.f32 %v1021_v28, %v1626_v39 }
 0x163   :  { %1220 = vst [vmem:[#allocation8 + $0x140] sm:$0xff] %v947_v22  ;;  %1222 = vst [vmem:[#allocation8 + $0x150] sm:$0xff] %v1020_v26 }
 0x164   :  { %1221 = vst [vmem:[#allocation8 + $0x148] sm:$0xff] %v949_v27  ;;  %1223 = vst [vmem:[#allocation8 + $0x158] sm:$0xff] %v1022_v29 }
 0x166   :  { %v952_v30 = vpop.f32.mrb[12].mxu0  ;;  %v1025_v32 = vpop.f32.mrb[12].mxu1 }
 0x167   :  { %v953_v31 = vadd.f32 %v952_v30, %v1617_v37  ;;  %v954_v33 = vpop.f32.mrb[13].mxu0  ;;  %v1026_v34 = vadd.f32 %v1025_v32, %v1620_v6  ;;  %v1027_v38 = vpop.f32.mrb[13].mxu1 }
 0x168   :  { %v955_v15 = vadd.f32 %v954_v33, %v1623_v20  ;;  %v956_v47 = vpop.f32.mrb[14].mxu0  ;;  %v1028_v36 = vadd.f32 %v1027_v38, %v1626_v39  ;;  %v1029_v40 = vpop.f32.mrb[14].mxu1 }
 0x169   :  { %1228 = vst [vmem:[#allocation8 + $0x180] sm:$0xff] %v953_v31  ;;  %v957_v61 = vadd.f32 %v956_v47, %v1617_v37  ;;  %v958_v41 = vpop.f32.mrb[15].mxu0  ;;  %1230 = vst [vmem:[#allocation8 + $0x190] sm:$0xff] %v1026_v34  ;;  %v1030_v42 = vadd.f32 %v1029_v40, %v1620_v6  ;;  %v1031_v44 = vpop.f32.mrb[15].mxu1  ;;  %v234_v37 = vsub.s32 6, %v1608_v25  ;;  %v1665_v6 = vrot.slane %v1611_v35, %v226_v46 }
 0x16a   :  { %1229 = vst [vmem:[#allocation8 + $0x188] sm:$0xff] %v955_v15  ;;  %v959_v43 = vadd.f32 %v958_v41, %v1623_v20  ;;  %1231 = vst [vmem:[#allocation8 + $0x198] sm:$0xff] %v1028_v36  ;;  %v1032_v45 = vadd.f32 %v1031_v44, %v1626_v39  ;;  %v1674_v39 = vrot.slane %v1611_v35, %v238_v49 }
 0x16b   :  { %1236 = vst [vmem:[#allocation8 + $0x1c0] sm:$0xff] %v957_v61  ;;  %1238 = vst [vmem:[#allocation8 + $0x1d0] sm:$0xff] %v1030_v42  ;;  %v1668_v20 = vrot.slane %v1611_v35, %v234_v37 }
 0x16c   :  { %1237 = vst [vmem:[#allocation8 + $0x1c8] sm:$0xff] %v959_v43  ;;  %1239 = vst [vmem:[#allocation8 + $0x1d8] sm:$0xff] %v1032_v45 }
 0x18e   :  { %v1068_v58 = vpop.f32.mrb[16].mxu0  ;;  %v1141_v52 = vpop.f32.mrb[16].mxu1 }
 0x18f   :  { %v1069_v51 = vadd.f32 %v1068_v58, %v1665_v6  ;;  %v1070_v53 = vpop.f32.mrb[17].mxu0  ;;  %v1142_v54 = vadd.f32 %v1141_v52, %v1668_v20  ;;  %v1143_v55 = vpop.f32.mrb[17].mxu1 }
 0x190   :  { %v1071_v25 = vadd.f32 %v1070_v53, %v1671_v50  ;;  %v1072_v56 = vpop.f32.mrb[18].mxu0  ;;  %v1144_v57 = vadd.f32 %v1143_v55, %v1674_v39  ;;  %v1145_v60 = vpop.f32.mrb[18].mxu1 }
 0x191   :  { %1184 = vst [vmem:[#allocation8 + $0x20] sm:$0xff] %v1069_v51  ;;  %v1073_v59 = vadd.f32 %v1072_v56, %v1665_v6  ;;  %v1074_v62 = vpop.f32.mrb[19].mxu0  ;;  %1186 = vst [vmem:[#allocation8 + $0x30] sm:$0xff] %v1142_v54  ;;  %v1146_v35 = vadd.f32 %v1145_v60, %v1668_v20  ;;  %v1147_v0 = vpop.f32.mrb[19].mxu1 }
 0x192   :  { %1185 = vst [vmem:[#allocation8 + $0x28] sm:$0xff] %v1071_v25  ;;  %v1075_v63 = vadd.f32 %v1074_v62, %v1671_v50  ;;  %1187 = vst [vmem:[#allocation8 + $0x38] sm:$0xff] %v1144_v57  ;;  %v1148_v1 = vadd.f32 %v1147_v0, %v1674_v39 }
 0x193   :  { %1192 = vst [vmem:[#allocation8 + $0x60] sm:$0xff] %v1073_v59  ;;  %1194 = vst [vmem:[#allocation8 + $0x70] sm:$0xff] %v1146_v35 }
 0x194   :  { %1193 = vst [vmem:[#allocation8 + $0x68] sm:$0xff] %v1075_v63  ;;  %1195 = vst [vmem:[#allocation8 + $0x78] sm:$0xff] %v1148_v1 }
 0x196   :  { %v1078_v2 = vpop.f32.mrb[20].mxu0  ;;  %v1151_v4 = vpop.f32.mrb[20].mxu1 }
 0x197   :  { %v1079_v3 = vadd.f32 %v1078_v2, %v1665_v6  ;;  %v1080_v5 = vpop.f32.mrb[21].mxu0  ;;  %v1152_v7 = vadd.f32 %v1151_v4, %v1668_v20  ;;  %v1153_v9 = vpop.f32.mrb[21].mxu1 }
 0x198   :  { %v1081_v8 = vadd.f32 %v1080_v5, %v1671_v50  ;;  %v1082_v10 = vpop.f32.mrb[22].mxu0  ;;  %v1154_v11 = vadd.f32 %v1153_v9, %v1674_v39  ;;  %v1155_v13 = vpop.f32.mrb[22].mxu1 }
 0x199   :  { %1200 = vst [vmem:[#allocation8 + $0xa0] sm:$0xff] %v1079_v3  ;;  %v1083_v12 = vadd.f32 %v1082_v10, %v1665_v6  ;;  %v1084_v14 = vpop.f32.mrb[23].mxu0  ;;  %1202 = vst [vmem:[#allocation8 + $0xb0] sm:$0xff] %v1152_v7  ;;  %v1156_v16 = vadd.f32 %v1155_v13, %v1668_v20  ;;  %v1157_v18 = vpop.f32.mrb[23].mxu1 }
 0x19a   :  { %1201 = vst [vmem:[#allocation8 + $0xa8] sm:$0xff] %v1081_v8  ;;  %v1085_v17 = vadd.f32 %v1084_v14, %v1671_v50  ;;  %1203 = vst [vmem:[#allocation8 + $0xb8] sm:$0xff] %v1154_v11  ;;  %v1158_v19 = vadd.f32 %v1157_v18, %v1674_v39 }
 0x19b   :  { %1208 = vst [vmem:[#allocation8 + $0xe0] sm:$0xff] %v1083_v12  ;;  %1210 = vst [vmem:[#allocation8 + $0xf0] sm:$0xff] %v1156_v16 }
 0x19c   :  { %1209 = vst [vmem:[#allocation8 + $0xe8] sm:$0xff] %v1085_v17  ;;  %1211 = vst [vmem:[#allocation8 + $0xf8] sm:$0xff] %v1158_v19 }
 0x19e   :  { %v1088_v21 = vpop.f32.mrb[24].mxu0  ;;  %v1161_v23 = vpop.f32.mrb[24].mxu1 }
 0x19f   :  { %v1089_v22 = vadd.f32 %v1088_v21, %v1665_v6  ;;  %v1090_v24 = vpop.f32.mrb[25].mxu0  ;;  %v1162_v26 = vadd.f32 %v1161_v23, %v1668_v20  ;;  %v1163_v28 = vpop.f32.mrb[25].mxu1 }
 0x1a0   :  { %v1091_v27 = vadd.f32 %v1090_v24, %v1671_v50  ;;  %v1092_v29 = vpop.f32.mrb[26].mxu0  ;;  %v1164_v30 = vadd.f32 %v1163_v28, %v1674_v39  ;;  %v1165_v32 = vpop.f32.mrb[26].mxu1 }
 0x1a1   :  { %1216 = vst [vmem:[#allocation8 + $0x120] sm:$0xff] %v1089_v22  ;;  %v1093_v31 = vadd.f32 %v1092_v29, %v1665_v6  ;;  %v1094_v33 = vpop.f32.mrb[27].mxu0  ;;  %1218 = vst [vmem:[#allocation8 + $0x130] sm:$0xff] %v1162_v26  ;;  %v1166_v34 = vadd.f32 %v1165_v32, %v1668_v20  ;;  %v1167_v38 = vpop.f32.mrb[27].mxu1 }
 0x1a2   :  { %1217 = vst [vmem:[#allocation8 + $0x128] sm:$0xff] %v1091_v27  ;;  %v1095_v15 = vadd.f32 %v1094_v33, %v1671_v50  ;;  %1219 = vst [vmem:[#allocation8 + $0x138] sm:$0xff] %v1164_v30  ;;  %v1168_v47 = vadd.f32 %v1167_v38, %v1674_v39 }
 0x1a3   :  { %1224 = vst [vmem:[#allocation8 + $0x160] sm:$0xff] %v1093_v31  ;;  %1226 = vst [vmem:[#allocation8 + $0x170] sm:$0xff] %v1166_v34 }
 0x1a4   :  { %1225 = vst [vmem:[#allocation8 + $0x168] sm:$0xff] %v1095_v15  ;;  %1227 = vst [vmem:[#allocation8 + $0x178] sm:$0xff] %v1168_v47 }
 0x1a6   :  { %v1098_v36 = vpop.f32.mrb[28].mxu0  ;;  %v1171_v40 = vpop.f32.mrb[28].mxu1 }
 0x1a7   :  { %v1099_v61 = vadd.f32 %v1098_v36, %v1665_v6  ;;  %v1100_v41 = vpop.f32.mrb[29].mxu0  ;;  %v1172_v42 = vadd.f32 %v1171_v40, %v1668_v20  ;;  %v1173_v44 = vpop.f32.mrb[29].mxu1 }
 0x1a8   :  { %v1101_v43 = vadd.f32 %v1100_v41, %v1671_v50  ;;  %v1102_v45 = vpop.f32.mrb[30].mxu0  ;;  %v1174_v46 = vadd.f32 %v1173_v44, %v1674_v39  ;;  %v1175_v48 = vpop.f32.mrb[30].mxu1 }
 0x1a9   :  { %1232 = vst [vmem:[#allocation8 + $0x1a0] sm:$0xff] %v1099_v61  ;;  %v1103_v37 = vadd.f32 %v1102_v45, %v1665_v6  ;;  %v1104_v49 = vpop.f32.mrb[31].mxu0  ;;  %1234 = vst [vmem:[#allocation8 + $0x1b0] sm:$0xff] %v1172_v42  ;;  %v1176_v58 = vadd.f32 %v1175_v48, %v1668_v20  ;;  %v1177_v52 = vpop.f32.mrb[31].mxu1 }
 0x1aa   :  { %1233 = vst [vmem:[#allocation8 + $0x1a8] sm:$0xff] %v1101_v43  ;;  %v1105_v51 = vadd.f32 %v1104_v49, %v1671_v50  ;;  %1235 = vst [vmem:[#allocation8 + $0x1b8] sm:$0xff] %v1174_v46  ;;  %v1178_v53 = vadd.f32 %v1177_v52, %v1674_v39 }
 0x1ab   :  { %1240 = vst [vmem:[#allocation8 + $0x1e0] sm:$0xff] %v1103_v37  ;;  %1242 = vst [vmem:[#allocation8 + $0x1f0] sm:$0xff] %v1176_v58 }
 0x1ac   :  { %1241 = vst [vmem:[#allocation8 + $0x1e8] sm:$0xff] %v1105_v51  ;;  %1243 = vst [vmem:[#allocation8 + $0x1f8] sm:$0xff] %v1178_v53 }
 0x1ad   :  { %1477 = shalt.err (!%p1474_p0)
}
 0x1ae   :  { %s1478_s27 = scalar_lea.hbm %s1723_s3, 8192 }
 0x1af   :  { %p1479_p1 = scmp.ne.s32.totalorder %s1723_s3, %s1478_s27  ;;  %p1482_p2 = scmp.lt.u32.totalorder %s1478_s27, %s1723_s3 }
 0x1b1   :  { %p1484_p3 = pnand %p1482_p2, %p1479_p1 }
 0x1b3   :  { %1487 = shalt.err (!%p1484_p3)
}
 0x1b4   :  { %s1502_s5 = smov 1024   ;;  %s1503_s6 = smov 64  }
 0x1b5   :  { %1255 = dma.vmem_to_hbm [thread:$0]  %s1250_s23, 8192, %s1723_s3, [#allocation4], %s1502_s5, %s1502_s5, %s1503_s6  }
 0x1b6   :  { %1492 = dma.done.wait [#allocation4], 8192  }
 0x1b7   :  { %1493 = vsyncadd [#allocation4], 4294959104 }
 0x1b8   :  { %1259 = vsyncpa [#allocation3], 1 }
 0x1b9   :  { %1260 = vsyncpa [#allocation6], 1 }
 0x1ba   :  { %1261 = vsyncpa [#allocation4], 1 }

</bundles_post_ra>
